<compile_context>
chip_gen: v5e
topology: v5e:2x2
jax: 0.10.0
libtpu: 0.0.40
codegen_flags: <defaults>
</compile_context>

<pallas_src>
import functools

import jax
import jax.numpy as jnp
from jax import lax
from jax.experimental import pallas as pl
from jax.experimental.pallas import tpu as pltpu


# dot_general dimension numbers.
_NT_DIMS = (((1,), (1,)), ((), ()))   # a @ b.T  (contract last dim of both)
_NN_DIMS = (((1,), (0,)), ((), ()))   # a @ b    (standard matmul)


def _swiglu_kernel(x_ref, w1_ref, w3_ref, w2t_ref, o_ref, acc_ref):
    """One (block_m, tf) step of SwiGLU.

    grid = (M_tiles, dff_tiles).  d_ff is the reduction axis: each step adds
    this d_ff tile's contribution to (gated @ W2^T) into a float32 VMEM
    accumulator; the output tile is written once at the last d_ff step.
    """
    k = pl.program_id(1)

    @pl.when(k == 0)
    def _init():
        acc_ref[...] = jnp.zeros_like(acc_ref)

    x = x_ref[...]            # (block_m, d_model)
    w1 = w1_ref[...]          # (tf, d_model)   W1 tile, native layout
    w3 = w3_ref[...]          # (tf, d_model)   W3 tile, native layout
    w2t = w2t_ref[...]        # (tf, d_model)   W2^T tile (pre-transposed once)

    # x @ W1_tile^T and x @ W3_tile^T — MXU, f32 accumulation.
    h1 = lax.dot_general(x, w1, _NT_DIMS, preferred_element_type=jnp.float32)
    h3 = lax.dot_general(x, w3, _NT_DIMS, preferred_element_type=jnp.float32)

    # silu(h1) * h3 in f32 (VPU + EUP).
    gated = (h1 * jax.nn.sigmoid(h1)) * h3                # (block_m, tf) f32

    # Partial of gated @ W2^T_tile — MXU-native NN contraction, f32 accumulate.
    acc_ref[...] += lax.dot_general(
        gated.astype(w2t.dtype), w2t, _NN_DIMS,
        preferred_element_type=jnp.float32)

    @pl.when(k == pl.num_programs(1) - 1)
    def _finalize():
        o_ref[...] = acc_ref[...].astype(o_ref.dtype)


def prepare_swiglu_weights(w1, w2, w3):
    """One-time weight prep (NOT per call): store W2 transposed, (d_ff, d_model),
    so the streamed k-axis weight DMA is contiguous and the third matmul is an
    MXU-native NN contraction.  W1/W3 stay in their native nn.Linear layout."""
    return w1, jnp.asarray(w2).T, w3


def _vmem_capacity_bytes() -> int:
    """Per-core VMEM capacity; conservative 64 MiB fallback if the query fails."""
    try:
        return int(pltpu.get_tpu_info().vmem_capacity_bytes)
    except Exception:  # not a TPU / old jax — be conservative (v7x-safe).
        return 64 * 1024 * 1024


def _estimate_vmem(block_m, tf, d_model, act_bytes, w_bytes) -> int:
    """Resident-bytes estimate for one grid step (double-buffered tiles +
    accumulator + the three (block_m, tf) f32 intermediates)."""
    return (2 * block_m * d_model * act_bytes          # x tile (2 buffers)
            + 2 * 3 * tf * d_model * w_bytes           # W1 + W3 + W2^T tiles
            + 2 * block_m * d_model * act_bytes        # output tile
            + block_m * d_model * 4                    # f32 accumulator scratch
            + 3 * block_m * tf * 4)                    # h1 / h3 / gated in f32


def _ff_tile_candidates(d_ff: int, cap: int):
    """Multiples of 128 dividing d_ff, descending, capped; else full d_ff."""
    top = (min(d_ff, cap) // 128) * 128
    cands = [t for t in range(top, 0, -128) if d_ff % t == 0]
    return cands if cands else [d_ff]


def _pick_ff_tile(d_ff: int, target: int) -> int:
    """Largest multiple-of-128 divisor of d_ff that is <= target (exact divisor
    keeps padded reduction columns out of the accumulator); else full d_ff."""
    if d_ff <= target:
        return d_ff
    for t in _ff_tile_candidates(d_ff, target):
        return t
    return d_ff


def _auto_tiles(M, d_model, d_ff, act_bytes, w_bytes, vmem_budget):
    """Pick (block_m, tf) jointly under the per-chip VMEM budget.

    block_m targets the roofline knee (~575-620 FLOP/weight-byte on v6e/v7x):
    768 on big-VMEM parts, 512 on v7x.  tf shrinks first when VMEM is tight."""
    target_m = 768 if vmem_budget >= 80 * 1024 * 1024 else 512
    block_m = min(target_m, M)
    if block_m < M:
        block_m = max(128, (block_m // 128) * 128)

    cands = _ff_tile_candidates(d_ff, 2048)
    while True:
        for tf in cands:
            est = _estimate_vmem(block_m, tf, d_model, act_bytes, w_bytes)
            if est + est // 4 <= vmem_budget:
                return block_m, tf
        if block_m > 128:
            block_m = max(128, block_m - 128)
        else:
            return block_m, cands[-1]


def swiglu_forward(x, w1, w2t, w3, *, block_m=None, block_ff=None):
    """Fused SwiGLU forward.

    x: [..., d_model]; w1, w3: (d_ff, d_model); w2t: (d_ff, d_model) — W2
    pre-transposed once via prepare_swiglu_weights.

    block_m / block_ff: optional overrides; by default chosen per chip from the
    VMEM capacity (bigger tiles on 128 MiB v5e/v6e, tighter co-selection on
    64 MiB v7x).
    """
    orig_shape = x.shape
    d_model = orig_shape[-1]
    d_ff = w1.shape[0]

    x2d = x.reshape(-1, d_model)
    M = x2d.shape[0]

    act_bytes = jnp.dtype(x.dtype).itemsize
    w_bytes = jnp.dtype(w1.dtype).itemsize

    vmem_cap = _vmem_capacity_bytes()
    vmem_budget = (vmem_cap * 4) // 5          # ~80% of physical VMEM

    if block_m is None and block_ff is None:
        block_m, tf = _auto_tiles(M, d_model, d_ff, act_bytes, w_bytes,
                                  vmem_budget)
    else:
        bm = block_m if block_m is not None else 512
        bm = min(bm, M)
        if bm < M:
            bm = max(128, (bm // 128) * 128)   # MXU-fill on 128x128 MXUs (v5e)
        block_m = bm
        tf = _pick_ff_tile(d_ff, block_ff if block_ff is not None else 1024)

    num_k = d_ff // tf
    num_m = pl.cdiv(M, block_m)
    grid = (num_m, num_k)

    est = _estimate_vmem(block_m, tf, d_model, act_bytes, w_bytes)
    vmem_limit = int(min((vmem_cap * 9) // 10,
                         max(vmem_budget, est + est // 4)))

    cost = pl.CostEstimate(
        flops=int(6 * M * d_model * d_ff),
        transcendentals=int(M * d_ff),
        bytes_accessed=int(2 * M * d_model * act_bytes          # x + out
                           + num_m * 3 * d_ff * d_model * w_bytes))

    out2d = pl.pallas_call(
        _swiglu_kernel,
        out_shape=jax.ShapeDtypeStruct((M, d_model), x.dtype),
        grid_spec=pltpu.PrefetchScalarGridSpec(
            num_scalar_prefetch=0,
            grid=grid,
            in_specs=[
                pl.BlockSpec((block_m, d_model), lambda i, k: (i, 0)),  # x
                pl.BlockSpec((tf, d_model), lambda i, k: (k, 0)),       # W1 tile
                pl.BlockSpec((tf, d_model), lambda i, k: (k, 0)),       # W3 tile
                pl.BlockSpec((tf, d_model), lambda i, k: (k, 0)),       # W2^T tile
            ],
            out_specs=pl.BlockSpec((block_m, d_model), lambda i, k: (i, 0)),
            scratch_shapes=[pltpu.VMEM((block_m, d_model), jnp.float32)],
        ),
        compiler_params=pltpu.CompilerParams(
            dimension_semantics=("parallel", "arbitrary"),
            vmem_limit_bytes=vmem_limit),
        cost_estimate=cost,
    )(x2d, w1, w3, w2t)

    return out2d.reshape(orig_shape)


def _reference_swiglu(x, w1, w2, w3):
    h1 = x @ w1.T
    h3 = x @ w3.T
    return ((h1 * jax.nn.sigmoid(h1)) * h3) @ w2.T


if __name__ == "__main__":
    # --- Test 1: tiny shapes from the module spec (f32, tight tolerance). ---
    batch, seq, d_model, d_ff = 2, 8, 32, 64
    key = jax.random.PRNGKey(0)
    kx, k1, k2, k3 = jax.random.split(key, 4)
    std = (2.0 / (d_model + d_ff)) ** 0.5

    x = jax.random.normal(kx, (batch, seq, d_model), dtype=jnp.float32)
    w1 = std * jax.random.normal(k1, (d_ff, d_model), dtype=jnp.float32)
    w2 = std * jax.random.normal(k2, (d_model, d_ff), dtype=jnp.float32)
    w3 = std * jax.random.normal(k3, (d_ff, d_model), dtype=jnp.float32)

    p1, p2t, p3 = prepare_swiglu_weights(w1, w2, w3)   # one-time W2 transpose
    out = jax.block_until_ready(swiglu_forward(x, p1, p2t, p3))
    ref = _reference_swiglu(x, w1, w2, w3)
    assert out.shape == (batch, seq, d_model)
    assert jnp.allclose(out, ref, atol=1e-4, rtol=1e-4), "f32 mismatch vs reference"

    # --- Test 2: bf16 path exercising M tiling + the streamed d_ff reduction. --
    batch2, seq2, d_model2, d_ff2 = 2, 256, 128, 512
    kx, k1, k2, k3 = jax.random.split(jax.random.PRNGKey(0), 4)
    std2 = (2.0 / (d_model2 + d_ff2)) ** 0.5

    x2 = jax.random.normal(kx, (batch2, seq2, d_model2),
                           dtype=jnp.float32).astype(jnp.bfloat16)
    w1b = (std2 * jax.random.normal(k1, (d_ff2, d_model2),
                                    dtype=jnp.float32)).astype(jnp.bfloat16)
    w2b = (std2 * jax.random.normal(k2, (d_model2, d_ff2),
                                    dtype=jnp.float32)).astype(jnp.bfloat16)
    w3b = (std2 * jax.random.normal(k3, (d_ff2, d_model2),
                                    dtype=jnp.float32)).astype(jnp.bfloat16)

    q1, q2t, q3 = prepare_swiglu_weights(w1b, w2b, w3b)
    out2 = jax.block_until_ready(
        swiglu_forward(x2, q1, q2t, q3, block_m=128, block_ff=256))
    ref2 = _reference_swiglu(x2.astype(jnp.float32), w1b.astype(jnp.float32),
                             w2b.astype(jnp.float32), w3b.astype(jnp.float32))
    assert out2.shape == (batch2, seq2, d_model2)
    assert jnp.allclose(out2.astype(jnp.float32), ref2, atol=2e-2, rtol=2e-2), \
        "bf16 mismatch vs reference"

    # --- Test 3: auto-tiling path (no overrides), bf16, larger M. ---
    out3 = jax.block_until_ready(swiglu_forward(x2, q1, q2t, q3))
    assert jnp.allclose(out3.astype(jnp.float32), ref2, atol=2e-2, rtol=2e-2), \
        "bf16 auto-tile mismatch vs reference"

    print("KERNEL_OK")
</pallas_src>

<mosaic_0001>
module attributes {stable_mosaic.version = 11 : i64} {
  func.func @_swiglu_kernel(%arg0: i32, %arg1: i32, %arg2: memref<16x32xf32, #tpu.memory_space<vmem>>, %arg3: memref<64x32xf32, #tpu.memory_space<vmem>>, %arg4: memref<64x32xf32, #tpu.memory_space<vmem>>, %arg5: memref<64x32xf32, #tpu.memory_space<vmem>>, %arg6: memref<16x32xf32, #tpu.memory_space<vmem>>, %arg7: memref<16x32xf32, #tpu.memory_space<vmem>>) attributes {dimension_semantics = [#tpu.dimension_semantics<parallel>, #tpu.dimension_semantics<arbitrary>], iteration_bounds = array<i64: 1, 1>, scalar_prefetch = 0 : i64, scratch_operands = 1 : i64, tpu.core_type = #tpu.core_type<tc>, window_params = [{transform_indices = @transform_0, window_bounds = array<i64: 16, 32>}, {transform_indices = @transform_1, window_bounds = array<i64: 64, 32>}, {transform_indices = @transform_2, window_bounds = array<i64: 64, 32>}, {transform_indices = @transform_3, window_bounds = array<i64: 64, 32>}, {transform_indices = @transform_4, window_bounds = array<i64: 16, 32>}]} {
    %c0_i32 = arith.constant 0 : i32
    %0 = arith.cmpi eq, %arg1, %c0_i32 : i32
    %1 = arith.extui %0 : i1 to i32
    %c0_i32_0 = arith.constant 0 : i32
    %2 = arith.cmpi ne, %1, %c0_i32_0 : i32
    scf.if %2 {
      %cst_17 = arith.constant 0.000000e+00 : f32
      %23 = vector.broadcast %cst_17 : f32 to vector<16x32xf32>
      %c0_18 = arith.constant 0 : index
      %c0_19 = arith.constant 0 : index
      %24 = vector.load %arg7[%c0_18, %c0_19] : memref<16x32xf32, #tpu.memory_space<vmem>>, vector<16x32xf32>
      tpu.vector_store %arg7[%c0_18, %c0_19], %23 {strides = array<i32>} : memref<16x32xf32, #tpu.memory_space<vmem>>, vector<16x32xf32>,
    } else {
    }
    %c0 = arith.constant 0 : index
    %c0_1 = arith.constant 0 : index
    %3 = vector.load %arg2[%c0, %c0_1] : memref<16x32xf32, #tpu.memory_space<vmem>>, vector<16x32xf32>
    %c0_2 = arith.constant 0 : index
    %c0_3 = arith.constant 0 : index
    %4 = vector.load %arg3[%c0_2, %c0_3] : memref<64x32xf32, #tpu.memory_space<vmem>>, vector<64x32xf32>
    %c0_4 = arith.constant 0 : index
    %c0_5 = arith.constant 0 : index
    %5 = vector.load %arg4[%c0_4, %c0_5] : memref<64x32xf32, #tpu.memory_space<vmem>>, vector<64x32xf32>
    %c0_6 = arith.constant 0 : index
    %c0_7 = arith.constant 0 : index
    %6 = vector.load %arg5[%c0_6, %c0_7] : memref<64x32xf32, #tpu.memory_space<vmem>>, vector<64x32xf32>
    %cst = arith.constant dense<0.000000e+00> : vector<16x64xf32>
    %7 = tpu.matmul %3, %4, %cst {dimension_numbers = #tpu.dot_dimension_numbers<[1], [1], [0], [0], [0, 0, 1, 0], [], []>} : vector<16x32xf32>, vector<64x32xf32>, vector<16x64xf32> -> vector<16x64xf32>
    %cst_8 = arith.constant dense<0.000000e+00> : vector<16x64xf32>
    %8 = tpu.matmul %3, %5, %cst_8 {dimension_numbers = #tpu.dot_dimension_numbers<[1], [1], [0], [0], [0, 0, 1, 0], [], []>} : vector<16x32xf32>, vector<64x32xf32>, vector<16x64xf32> -> vector<16x64xf32>
    %9 = arith.negf %7 : vector<16x64xf32>
    %10 = math.exp %9 : vector<16x64xf32>
    %cst_9 = arith.constant 1.000000e+00 : f32
    %11 = vector.broadcast %cst_9 : f32 to vector<16x64xf32>
    %12 = arith.addf %11, %10 : vector<16x64xf32>
    %13 = arith.divf %11, %12 : vector<16x64xf32>
    %14 = arith.mulf %7, %13 : vector<16x64xf32>
    %15 = arith.mulf %14, %8 : vector<16x64xf32>
    %c0_10 = arith.constant 0 : index
    %c0_11 = arith.constant 0 : index
    %16 = vector.load %arg7[%c0_10, %c0_11] : memref<16x32xf32, #tpu.memory_space<vmem>>, vector<16x32xf32>
    %cst_12 = arith.constant dense<0.000000e+00> : vector<16x32xf32>
    %17 = tpu.matmul %15, %6, %cst_12 {dimension_numbers = #tpu.dot_dimension_numbers<[1], [0], [0], [1], [0, 0, 1, 1], [], []>} : vector<16x64xf32>, vector<64x32xf32>, vector<16x32xf32> -> vector<16x32xf32>
    %18 = arith.addf %16, %17 : vector<16x32xf32>
    %c0_13 = arith.constant 0 : index
    %c0_14 = arith.constant 0 : index
    %19 = vector.load %arg7[%c0_13, %c0_14] : memref<16x32xf32, #tpu.memory_space<vmem>>, vector<16x32xf32>
    tpu.vector_store %arg7[%c0_13, %c0_14], %18 {strides = array<i32>} : memref<16x32xf32, #tpu.memory_space<vmem>>, vector<16x32xf32>,
    %c0_i32_15 = arith.constant 0 : i32
    %20 = arith.cmpi eq, %arg1, %c0_i32_15 : i32
    %21 = arith.extui %20 : i1 to i32
    %c0_i32_16 = arith.constant 0 : i32
    %22 = arith.cmpi ne, %21, %c0_i32_16 : i32
    scf.if %22 {
      %c0_17 = arith.constant 0 : index
      %c0_18 = arith.constant 0 : index
      %23 = vector.load %arg7[%c0_17, %c0_18] : memref<16x32xf32, #tpu.memory_space<vmem>>, vector<16x32xf32>
      %c0_19 = arith.constant 0 : index
      %c0_20 = arith.constant 0 : index
      %24 = vector.load %arg6[%c0_19, %c0_20] : memref<16x32xf32, #tpu.memory_space<vmem>>, vector<16x32xf32>
      tpu.vector_store %arg6[%c0_19, %c0_20], %23 {strides = array<i32>} : memref<16x32xf32, #tpu.memory_space<vmem>>, vector<16x32xf32>,
    } else {
    }
    return
  }
  func.func @transform_0(%arg0: i32, %arg1: i32) -> (i32, i32) {
    %c0_i32 = arith.constant 0 : i32
    %c0_i32_0 = arith.constant 0 : i32
    return %arg0, %c0_i32 : i32, i32
  }
  func.func @transform_1(%arg0: i32, %arg1: i32) -> (i32, i32) {
    %c0_i32 = arith.constant 0 : i32
    %c0_i32_0 = arith.constant 0 : i32
    return %arg1, %c0_i32 : i32, i32
  }
  func.func @transform_2(%arg0: i32, %arg1: i32) -> (i32, i32) {
    %c0_i32 = arith.constant 0 : i32
    %c0_i32_0 = arith.constant 0 : i32
    return %arg1, %c0_i32 : i32, i32
  }
  func.func @transform_3(%arg0: i32, %arg1: i32) -> (i32, i32) {
    %c0_i32 = arith.constant 0 : i32
    %c0_i32_0 = arith.constant 0 : i32
    return %arg1, %c0_i32 : i32, i32
  }
  func.func @transform_4(%arg0: i32, %arg1: i32) -> (i32, i32) {
    %c0_i32 = arith.constant 0 : i32
    %c0_i32_0 = arith.constant 0 : i32
    return %arg0, %c0_i32 : i32, i32
  }
}

</mosaic_0001>

<bundles_post_ra>
// kernel: tpu_custom_call.1
= control target key start
LH: loop header
LB: loop body
LE: loop exit
PB: predicated region body
PF: predicated region fallthrough
CT: control target
= control target key end

     0   :  { %vm22_vm0 = vcmask 261120   ;;  %s469_s0 = inlined_call_operand.vmem [shape: f32[16,32], index: 0, kind: input, shape index: {}]   ;;  %s470_s1 = inlined_call_operand.vmem [shape: f32[64,32], index: 1, kind: input, shape index: {}]   ;;  %s471_s2 = inlined_call_operand.vmem [shape: f32[64,32], index: 2, kind: input, shape index: {}]   ;;  %s472_s3 = inlined_call_operand.vmem [shape: f32[64,32], index: 3, kind: input, shape index: {}]   ;;  %s473_s4 = inlined_call_operand.hbm [shape: f32[16,32], index: 4, kind: output, shape index: {}]  }
   0x1   :  { %v34_v0 = vld [vmem:[%s470_s1 + $0x38] sm:$0xff]  ;;  %v33_v1 = vld [vmem:[%s470_s1 + $0x30] sm:$0xff]  ;;  %v32_v4 = vld [vmem:[%s470_s1 + $0x28] sm:$0xff] }
   0x2   :  { %255 = vmatpush.xpose.msk.msra.mxu0 %vm22_vm0, %v34_v0  ;;  %279 = vmatpush.xpose.msk.msra.mxu3 %vm22_vm0, %v34_v0  ;;  %v42_v2 = vld [vmem:[%s471_s2 + $0x38] sm:$0xff]  ;;  %v41_v3 = vld [vmem:[%s471_s2 + $0x30] sm:$0xff] }
   0x3   :  { %265 = vmatpush.xpose.msk.msra.mxu1 %vm22_vm0, %v42_v2 }
   0x6   :  { %256 = vmatpush.xpose.msk.msra.mxu0 %vm22_vm0, %v33_v1  ;;  %280 = vmatpush.xpose.msk.msra.mxu3 %vm22_vm0, %v33_v1 }
   0x7   :  { %9 = vsyncpa [#allocation4], 0  ;;  %266 = vmatpush.xpose.msk.msra.mxu1 %vm22_vm0, %v41_v3  ;;  %v40_v5 = vld [vmem:[%s471_s2 + $0x28] sm:$0xff]  ;;  %v31_v6 = vld [vmem:[%s470_s1 + $0x20] sm:$0xff]  ;;  %v325_v32 = vmov 0.0   ;;  %vm196_vm6 = vcmask 523264  }
   0x8   :  { %v39_v7 = vld [vmem:[%s471_s2 + $0x20] sm:$0xff]  ;;  %v30_v8 = vld [vmem:[%s470_s1 + $0x18] sm:$0xff]  ;;  %v29_v10 = vld [vmem:[%s470_s1 + $0x10] sm:$0xff]  ;;  %23 = vst.msk [vmem:[#allocation2] sm:$0xff] %vm22_vm0, %v325_v32  ;;  %s243_s15 = sshll.u32 %s473_s4, 4  ;;  %s327_s16 = smov 128   ;;  %s244_s15 = int_to_ptr.hbm [resolvable:$true] %s243_s15 }
   0x9   :  { %v38_v9 = vld [vmem:[%s471_s2 + $0x18] sm:$0xff]  ;;  %v37_v11 = vld [vmem:[%s471_s2 + $0x10] sm:$0xff]  ;;  %v28_v12 = vld [vmem:[%s470_s1 + $0x8] sm:$0xff]  ;;  %24 = vst.msk [vmem:[#allocation2 + $0x8] sm:$0xff] %vm22_vm0, %v325_v32  ;;  %s328_s17 = smov 8  }
   0xa   :  { %257 = vmatpush.xpose.msk.msra.mxu0 %vm22_vm0, %v32_v4  ;;  %281 = vmatpush.xpose.msk.msra.mxu3 %vm22_vm0, %v32_v4  ;;  %v36_v13 = vld [vmem:[%s471_s2 + $0x8] sm:$0xff]  ;;  %v27_v14 = vld [vmem:[%s470_s1] sm:$0xff]  ;;  %v50_v18 = vld [vmem:[%s472_s3 + $0x38] sm:$0xff] }
   0xb   :  { %267 = vmatpush.xpose.msk.msra.mxu1 %vm22_vm0, %v40_v5  ;;  %v35_v15 = vld [vmem:[%s471_s2] sm:$0xff]  ;;  %v26_v17 = vld [vmem:[%s469_s0 + $0x8] sm:$0xff]  ;;  %211 = vmatpush.msra.mxu2 %v50_v18  ;;  %v49_v19 = vld [vmem:[%s472_s3 + $0x30] sm:$0xff] }
   0xc   :  { %v25_v16 = vld [vmem:[%s469_s0] sm:$0xff]  ;;  %v48_v20 = vld [vmem:[%s472_s3 + $0x28] sm:$0xff]  ;;  %v46_v22 = vld [vmem:[%s472_s3 + $0x18] sm:$0xff] }
   0xd   :  { %212 = vmatpush.msra.mxu2 %v49_v19  ;;  %v47_v21 = vld [vmem:[%s472_s3 + $0x20] sm:$0xff]  ;;  %v45_v23 = vld [vmem:[%s472_s3 + $0x10] sm:$0xff]  ;;  %v44_v24 = vld [vmem:[%s472_s3 + $0x8] sm:$0xff] }
   0xe   :  { %258 = vmatpush.xpose.msk.msra.mxu0 %vm22_vm0, %v31_v6  ;;  %282 = vmatpush.xpose.msk.msra.mxu3 %vm22_vm0, %v31_v6  ;;  %v43_v25 = vld [vmem:[%s472_s3] sm:$0xff]  ;;  %s326_s3 = smov [#allocation3]  }
   0xf   :  { %268 = vmatpush.xpose.msk.msra.mxu1 %vm22_vm0, %v39_v7  ;;  %213 = vmatpush.msra.mxu2 %v48_v20  ;;  %v194_v61 = vld [vmem:[#allocation2] sm:$0xff]  ;;  %s241_s12 = sshll.u32 %s326_s3, 4  ;;  %s242_s12 = int_to_ptr.vmem [resolvable:$true] %s241_s12 }
  0x10   :  { %v195_v0 = vld [vmem:[#allocation2 + $0x8] sm:$0xff] }
  0x11   :  { %214 = vmatpush.msra.mxu2 %v47_v21 }
  0x12   :  { %259 = vmatpush.xpose.msk.msra.mxu0 %vm22_vm0, %v30_v8  ;;  %283 = vmatpush.xpose.msk.msra.mxu3 %vm22_vm0, %v30_v8 }
  0x13   :  { %269 = vmatpush.xpose.msk.msra.mxu1 %vm22_vm0, %v38_v9  ;;  %215 = vmatpush.msra.mxu2 %v46_v22 }
  0x15   :  { %216 = vmatpush.msra.mxu2 %v45_v23 }
  0x16   :  { %260 = vmatpush.xpose.msk.msra.mxu0 %vm22_vm0, %v29_v10  ;;  %284 = vmatpush.xpose.msk.msra.mxu3 %vm22_vm0, %v29_v10 }
  0x17   :  { %270 = vmatpush.xpose.msk.msra.mxu1 %vm22_vm0, %v37_v11  ;;  %217 = vmatpush.msra.mxu2 %v44_v24 }
  0x19   :  { %218 = vmatpush.msra.mxu2 %v43_v25 }
  0x1a   :  { %261 = vmatpush.xpose.msk.msra.mxu0 %vm22_vm0, %v28_v12  ;;  %285 = vmatpush.xpose.msk.msra.mxu3 %vm22_vm0, %v28_v12 }
  0x1b   :  { %271 = vmatpush.xpose.msk.msra.mxu1 %vm22_vm0, %v36_v13 }
  0x1e   :  { %262 = vmatpush.xpose.msk.msra.mxu0 %vm22_vm0, %v27_v14  ;;  %286 = vmatpush.xpose.msk.msra.mxu3 %vm22_vm0, %v27_v14 }
  0x1f   :  { %272 = vmatpush.xpose.msk.msra.mxu1 %vm22_vm0, %v35_v15 }
  0x21   :  { %263 = vmatmul.msk.f32.vlgmr.msra.gmra.mxu0 %vm22_vm0, %v25_v16  ;;  %264 = vmatmul.msk.f32.vlgmr.msra.gmra.mxu3 %vm22_vm0, %v26_v17 }
  0x22   :  { %273 = vmatmul.msk.f32.vlgmr.msra.gmra.mxu1 %vm22_vm0, %v25_v16 }
  0x2a   :  { %274 = vmatmul.msk.f32.gmra.mxu1 %vm22_vm0, %v26_v17 }
  0x9e   :  { %v99_v26 = vpop.f32.mrf.mxu0 }
  0x9f   :  { %v275_v27 = vmul.f32 -1.442695, %v99_v26  ;;  %v146_v45 = vpop.f32.mrf.mxu1 }
  0xa1   :  { %291 = vpow2.f32 %v275_v27 }
  0xa4   :  { %v102_v28 = vpop.f32.mrf.mxu3 }
  0xa5   :  { %v276_v29 = vmul.f32 -1.442695, %v102_v28 }
  0xa7   :  { %v292_v30 = vpop.eup %291  ;;  %293 = vpow2.f32 %v276_v29  ;;  %v149_v59 = vpop.f32.mrf.mxu1 }
  0xa8   :  { %v158_v31 = vadd.f32 1.0, %v292_v30 }
  0xaa   :  { %295 = vrcp.f32 %v158_v31  ;;  %v171_v38 = vand.u32 2147483648, %v158_v31  ;;  %v169_v40 = vand.u32 2147483647, %v158_v31  ;;  %vm165_vm2 = vweird.f32 %v158_v31 }
  0xac   :  { %v172_v44 = vor.u32 1.1754944e-38, %v171_v38  ;;  %vm170_vm4 = vcmp.eq.f32.partialorder %v169_v40, 8.507059e+37 }
  0xad   :  { %v294_v33 = vpop.eup %293 }
  0xae   :  { %v159_v34 = vadd.f32 1.0, %v294_v33 }
  0xb0   :  { %v296_v35 = vpop.eup %295  ;;  %297 = vrcp.f32 %v159_v34  ;;  %v186_v49 = vand.u32 2147483648, %v159_v34  ;;  %v184_v52 = vand.u32 2147483647, %v159_v34  ;;  %vm180_vm7 = vweird.f32 %v159_v34 }
  0xb1   :  { %v161_v36 = vmul.f32 %v296_v35, %v158_v31  ;;  %vm166_vm1 = vweird.f32 %v296_v35 }
  0xb2   :  { %vm167_vm3 = vmor %vm165_vm2, %vm166_vm1  ;;  %v187_v55 = vor.u32 1.1754944e-38, %v186_v49  ;;  %vm185_vm9 = vcmp.eq.f32.partialorder %v184_v52, 8.507059e+37 }
  0xb3   :  { %v162_v37 = vsub.f32 1.0, %v161_v36 }
  0xb5   :  { %v163_v39 = vmul.f32 %v296_v35, %v162_v37 }
  0xb6   :  { %v298_v41 = vpop.eup %297 }
  0xb7   :  { %v164_v42 = vadd.f32 %v296_v35, %v163_v39  ;;  %v176_v43 = vmul.f32 %v298_v41, %v159_v34  ;;  %vm181_vm5 = vweird.f32 %v298_v41 }
  0xb8   :  { %vm182_vm8 = vmor %vm180_vm7, %vm181_vm5 }
  0xb9   :  { %v168_v46 = vsel %vm167_vm3, %v296_v35, %v164_v42  ;;  %v177_v47 = vsub.f32 1.0, %v176_v43 }
  0xba   :  { %v173_v48 = vsel %vm170_vm4, %v172_v44, %v168_v46 }
  0xbb   :  { %v190_v50 = vmul.f32 %v173_v48, %v99_v26  ;;  %v178_v51 = vmul.f32 %v298_v41, %v177_v47 }
  0xbd   :  { %v179_v53 = vadd.f32 %v298_v41, %v178_v51  ;;  %v192_v54 = vmul.f32 %v190_v50, %v146_v45 }
  0xbf   :  { %v183_v56 = vsel %vm182_vm8, %v298_v41, %v179_v53  ;;  %277 = vmatmul.msk.f32.vlgmr.msra.gmra.mxu2 %vm196_vm6, %v192_v54 }
  0xc0   :  { %v188_v57 = vsel %vm185_vm9, %v187_v55, %v183_v56 }
  0xc1   :  { %v191_v58 = vmul.f32 %v188_v57, %v102_v28 }
  0xc3   :  { %v193_v60 = vmul.f32 %v191_v58, %v149_v59 }
  0xc7   :  { %278 = vmatmul.msk.f32.gmra.mxu2 %vm196_vm6, %v193_v60 }
 0x142   :  { %v220_v62 = vpop.f32.mrf.mxu2 }
 0x143   :  { %v226_v63 = vadd.f32 %v220_v62, %v194_v61 }
 0x145   :  { %228 = vst.msk [vmem:[#allocation2] sm:$0xff] %vm22_vm0, %v226_v63 }
 0x14a   :  { %v223_v1 = vpop.f32.mrf.mxu2 }
 0x14b   :  { %v227_v2 = vadd.f32 %v223_v1, %v195_v0 }
 0x14c   :  { %v233_v3 = vld [vmem:[#allocation2] sm:$0xff] }
 0x14d   :  { %229 = vst.msk [vmem:[#allocation2 + $0x8] sm:$0xff] %vm22_vm0, %v227_v2 }
 0x14e   :  { %235 = vst.msk [vmem:[#allocation3] sm:$0xff] %vm22_vm0, %v233_v3 }
 0x154   :  { %v234_v4 = vld [vmem:[#allocation2 + $0x8] sm:$0xff] }
 0x155   :  { %236 = vst.msk [vmem:[#allocation3 + $0x8] sm:$0xff] %vm22_vm0, %v234_v4 }
 0x156   :  { %249 = dma.vmem_to_hbm [thread:$0]  %s242_s12, 256, %s244_s15, [#allocation4], %s327_s16, %s327_s16, %s328_s17  }
 0x157   :  { %323 = dma.done.wait [#allocation4], 256  }
 0x158   :  { %324 = vsyncadd [#allocation4], 4294967040 }
 0x159   :  { %254 = vsyncpa [#allocation4], 1 }

</bundles_post_ra>
